<compile_context>
chip_gen: v5e
topology: v5e:2x2
jax: 0.10.0
libtpu: 0.0.40
codegen_flags: <defaults>
</compile_context>

<pallas_src>
import random
import numpy as np

import jax
import jax.numpy as jnp
from jax.experimental import pallas as pl
from jax.experimental.pallas import tpu as pltpu

POS_TH = 0.5
NEG_TH = 0.1
P_MAX = 64                     # max number of positive ROIs kept (matches torch sampling cap)
P_PAD = 128                    # padded positive-ROI axis
_IOU_ELEM_CAP = 256 * 1024     # cap on n_gt * tile (bounds live (n_gt, tile) intermediates)


def _is_two_core_chip():
    """Best-effort detection of 2-TensorCore chips (v7x); defaults to False."""
    try:
        kind = jax.devices()[0].device_kind.lower()
    except Exception:
        return False
    return ("v7" in kind) or ("7x" in kind)


# ----------------------------------------------------------------------------
# Kernel 1: pairwise IoU GT x ROI fused with a packed max/argmax over the GT axis
#           and on-device pos/neg thresholding.
#   GT inputs : five (n_gt, 1) columns (xmin, ymin, xmax, ymax, area)  -- hoisted prep
#   roi_ref   : (4, TR)  (ROIs on the 128-lane axis)
#   output    : (2, TR) int32:  row 0 = code {1 pos, -1 neg, 0 ignore},  row 1 = argmax GT idx
# ----------------------------------------------------------------------------
def _make_iou_kernel(n_gt):
    idx_bits = max(1, (n_gt - 1).bit_length())
    low_mask = (1 << idx_bits) - 1

    def kernel(gxmin_ref, gymin_ref, gxmax_ref, gymax_ref, garea_ref, roi_ref, out_ref):
        gxmin = gxmin_ref[...]            # (n_gt, 1)
        gymin = gymin_ref[...]
        gxmax = gxmax_ref[...]
        gymax = gymax_ref[...]
        garea = garea_ref[...]            # (n_gt, 1) precomputed GT areas
        roi = roi_ref[...]                # (4, TR)

        rxmin = roi[0:1, :]
        rymin = roi[1:2, :]
        rxmax = roi[2:3, :]
        rymax = roi[3:4, :]

        big_min_x = jnp.maximum(gxmin, rxmin)              # (n_gt, TR)
        big_min_y = jnp.maximum(gymin, rymin)
        small_max_x = jnp.minimum(gxmax, rxmax)
        small_max_y = jnp.minimum(gymax, rymax)
        overlap_x = jnp.maximum(small_max_x - big_min_x, 0.0)
        overlap_y = jnp.maximum(small_max_y - big_min_y, 0.0)
        i_area = overlap_x * overlap_y
        roi_area = (rxmax - rxmin) * (rymax - rymin)       # (1, TR)
        u_area = roi_area + garea - i_area
        # exact divide (parity with the reference; approx reciprocal could flip thresholds)
        iou = i_area / (u_area + 1e-8)                     # (n_gt, TR)

        # Single-pass fused max/argmax: pack the inverted GT index into the low idx_bits
        # mantissa bits of the (non-negative) IoU bit pattern, then ONE sublane max-reduce.
        # Top bits are untouched -> packed ints stay non-negative, so signed max == value order.
        # Deviations vs the exact reference: maxiou is truncated by < 2^idx_bits ulps (~1e-6
        # relative) and near-ties (< ~1e-6 relative) break toward the lower GT index.
        bits = pltpu.bitcast(iou, jnp.int32)
        inv_idx = (n_gt - 1) - jax.lax.broadcasted_iota(jnp.int32, iou.shape, 0)
        packed = (bits & jnp.int32(~low_mask)) | inv_idx
        best = jnp.max(packed, axis=0, keepdims=True)      # (1, TR) single sublane reduce

        arg = (n_gt - 1) - (best & jnp.int32(low_mask))    # first (lowest-index) maximum on ties
        maxiou = pltpu.bitcast(best & jnp.int32(~low_mask), jnp.float32)
        code = jnp.where(maxiou > POS_TH, 1, jnp.where(maxiou <= NEG_TH, -1, 0))

        out_ref[0:1, :] = code.astype(jnp.int32)
        out_ref[1:2, :] = arg.astype(jnp.int32)

    return kernel


def iou_code_argmax_pallas(gt_box_np, roi_box, max_tile=4096):
    """gt_box_np: (n_gt,4) f32 numpy;  roi_box: (n_roi,4).
       Returns a single (2, n_roi) int32 device array: [pos/neg/ignore code, argmax GT index]."""
    n_gt = int(gt_box_np.shape[0])
    n_roi = int(roi_box.shape[0])
    assert n_roi % 128 == 0, "example keeps n_roi a multiple of the 128-lane tile"

    # Tile sizing: one big tile when it fits (per-step overhead ~0.35us would dominate this
    # VPU-light kernel), but cap n_gt*tile so the live (n_gt, tile) intermediates stay within
    # v5e's 16 MiB / v7x's 32 MiB scoped VMEM.  On 2-TC parts (v7x) split large n_roi in two so
    # the "parallel" grid axis shards across both cores.
    cap = max(128, (_IOU_ELEM_CAP // max(n_gt, 1)) // 128 * 128)
    tile = min(n_roi, max_tile, cap)
    if _is_two_core_chip() and n_roi >= 2048:
        tile = min(tile, n_roi // 2)
    tile = max(128, (tile // 128) * 128)
    while n_roi % tile != 0:
        tile -= 128

    # GT-side prep hoisted out of the kernel: per-coordinate (n_gt,1) columns + precomputed
    # areas (no per-grid-step lane extracts / area recompute inside the kernel).
    gxmin = jnp.asarray(gt_box_np[:, 0:1], jnp.float32)
    gymin = jnp.asarray(gt_box_np[:, 1:2], jnp.float32)
    gxmax = jnp.asarray(gt_box_np[:, 2:3], jnp.float32)
    gymax = jnp.asarray(gt_box_np[:, 3:4], jnp.float32)
    garea = jnp.asarray(
        ((gt_box_np[:, 2] - gt_box_np[:, 0]) * (gt_box_np[:, 3] - gt_box_np[:, 1]))[:, None],
        jnp.float32)
    roi_t = jnp.transpose(jnp.asarray(roi_box, jnp.float32))        # (4, n_roi) lane-dense

    gt_spec = lambda: pl.BlockSpec((n_gt, 1), lambda j: (0, 0))
    return pl.pallas_call(
        _make_iou_kernel(n_gt),
        out_shape=jax.ShapeDtypeStruct((2, n_roi), jnp.int32),
        grid=(n_roi // tile,),
        in_specs=[gt_spec(), gt_spec(), gt_spec(), gt_spec(), gt_spec(),
                  pl.BlockSpec((4, tile), lambda j: (0, j))],
        out_specs=pl.BlockSpec((2, tile), lambda j: (0, j)),
        compiler_params=pltpu.CompilerParams(
            dimension_semantics=("parallel",),
            vmem_limit_bytes=32 * 1024 * 1024),
    )(gxmin, gymin, gxmax, gymax, garea, roi_t)


# ----------------------------------------------------------------------------
# Kernel 2: cross-entropy (ignore_index=-1, mean) + fused class-specific pred_loc gather
#           + smooth-L1 loc loss -> scalar (via SMEM).  Gridless single invocation.
#   cls_ref  (C, N)         lane-dense logits (classes on sublanes, ROIs on lanes)
#   gtc_ref  (1, N)         int32 labels, -1 = ignore
#   ploc_ref (N, 4*C_fg)    raw head loc predictions (reshape of (N, C_fg, 4))
#   idx_ref  (P_PAD, 1)     positive ROI indices (padded with 0)
#   gloc_ref (P_PAD, 4*C_fg) gt targets scattered into the selected class window, 0 elsewhere
#   w_ref    (P_PAD, 4*C_fg) 1.0 inside the selected class window of real positives, else 0
# ----------------------------------------------------------------------------
def _loss_kernel(cls_ref, gtc_ref, ploc_ref, idx_ref, gloc_ref, w_ref, out_ref):
    # ---- cross-entropy over all ROIs ----
    logits = cls_ref[...].astype(jnp.float32)                   # (C, N)
    labels = gtc_ref[...]                                       # (1, N)
    m = jnp.max(logits, axis=0, keepdims=True)                  # sublane reduce
    lse = m + jnp.log(jnp.sum(jnp.exp(logits - m), axis=0, keepdims=True))
    cls_iota = jax.lax.broadcasted_iota(jnp.int32, logits.shape, 0)
    picked = jnp.sum(jnp.where(cls_iota == labels, logits, 0.0), axis=0, keepdims=True)
    valid = (labels >= 0).astype(jnp.float32)
    ce_sum = jnp.sum((lse - picked) * valid)
    ce_cnt = jnp.sum(valid)
    # TODO(synk): for realistic class counts (C ~ 81+) chunk the class axis with a fori_loop
    # (running max, then exp-sum / gather accumulate) to bound live (C, N) temporaries.

    # ---- fused class-specific pred_loc gather + smooth-L1 over positive ROIs ----
    # One-hot ROW gather (MXU): rows[p, :] = pred_loc2[idx_pos[p], :].  The class-window
    # selection is pre-scattered on the host into gloc/w (zeros elsewhere), so non-selected
    # columns and padded rows contribute exactly 0 to the loss.
    ploc2 = ploc_ref[...]                                        # (N, 4*C_fg)
    idx_pos = idx_ref[...]                                       # (P_PAD, 1) int32
    roi_iota = jax.lax.broadcasted_iota(jnp.int32, (P_PAD, ploc2.shape[0]), 1)
    onehot = (roi_iota == idx_pos).astype(jnp.float32)           # (P_PAD, N)
    rows = jnp.dot(onehot, ploc2, preferred_element_type=jnp.float32)   # (P_PAD, 4*C_fg)

    w = w_ref[...]
    d = rows - gloc_ref[...]
    ad = jnp.abs(d)
    sl1 = jnp.where(ad < 1.0, 0.5 * d * d, ad - 0.5) * w
    loc_sum = jnp.sum(sl1)
    n_pos = jnp.sum(w) * 0.25                                    # 4 weight-ones per positive ROI

    # NOTE: torch mean-reduction returns NaN with zero valid labels / zero positives;
    # keep the loss finite in those degenerate cases instead (documented deviation).
    loss = ce_sum / jnp.maximum(ce_cnt, 1.0) + loc_sum / jnp.maximum(n_pos, 1.0)
    out_ref[0, 0] = loss


def head_loss_pallas(pred_cls_t, gt_cls_row, pred_loc2, idx_pad, gt_loc_w, loc_w):
    in_bytes = 4 * (pred_cls_t.size + gt_cls_row.size + pred_loc2.size +
                    idx_pad.size + gt_loc_w.size + loc_w.size)
    # Gridless single invocation -> every block is the full array and single-buffered.
    # Explicit 32 MiB scoped VMEM (v5e defaults to 16 MiB) leaves ample headroom.
    assert in_bytes <= 12 * 1024 * 1024, "tile the ROI axis for very large inputs"
    # TODO(synk): tiled (grid-over-ROI) variant with partial CE/loc accumulators for huge N.
    return pl.pallas_call(
        _loss_kernel,
        out_shape=jax.ShapeDtypeStruct((1, 1), jnp.float32),
        out_specs=pl.BlockSpec(memory_space=pltpu.SMEM),   # scalar out via SMEM (no padded vst)
        compiler_params=pltpu.CompilerParams(vmem_limit_bytes=32 * 1024 * 1024),
    )(pred_cls_t, gt_cls_row, pred_loc2, idx_pad, gt_loc_w, loc_w)


# ----------------------------------------------------------------------------
# Host-side glue reproducing HeadLoss.bbox2target / forward
# ----------------------------------------------------------------------------
def head_loss_forward(pred_cls, pred_loc, gt_box, roi_box, labels):
    """pred_cls: (N, C) f32;  pred_loc: (N, C_fg, 4) f32;  gt_box: (1, n_gt, 4);
       roi_box: (N, 4);  labels: (1, n_gt) int.  Returns the (1, 1) loss on device."""
    n_roi = pred_cls.shape[0]
    c_fg = pred_loc.shape[1]

    gt_box_np = np.asarray(gt_box, dtype=np.float32)[0]

    # (1) dispatch the IoU/match kernel, then (2) stage the loss-kernel operand layouts and the
    # tiny host copies of the inputs -- all of this overlaps the device->host transfer below.
    packed_d = iou_code_argmax_pallas(gt_box_np, roi_box)
    pred_cls_t = jnp.transpose(jnp.asarray(pred_cls, jnp.float32))            # (C, N) lane-dense
    pred_loc2 = jnp.reshape(jnp.asarray(pred_loc, jnp.float32), (n_roi, 4 * c_fg))
    roi_box_np = np.asarray(roi_box, dtype=np.float32)
    labels_np = np.asarray(labels)[0]

    # (3) the single blocking device->host sync of this forward pass.
    packed = np.asarray(packed_d)                       # (2, n_roi) int32
    code, gt_roi = packed[0], packed[1]

    # TODO(synk): data-dependent positive/negative sampling (np.where + random.sample) stays on
    # host; no clean fixed-shape Pallas equivalent for Python-RNG dynamic index sampling.
    idx_pos_roi = np.where(code == 1)[0]
    gt_pos_roi = gt_roi[idx_pos_roi]
    if len(idx_pos_roi) > P_MAX:
        _r = random.sample(range(len(idx_pos_roi)), P_MAX)
        idx_pos_roi = idx_pos_roi[_r]
        gt_pos_roi = gt_pos_roi[_r]
    idx_neg_roi = np.where(code == -1)[0]
    _r = random.sample(range(len(idx_neg_roi)), min(128 - len(idx_pos_roi), len(idx_neg_roi)))
    idx_neg_roi = idx_neg_roi[_r]

    # regression targets (tiny host numpy, matches the torch reference exactly)
    gt_xmin, gt_ymin, gt_xmax, gt_ymax = [gt_box_np[:, k] for k in range(4)]
    roi_xmin, roi_ymin, roi_xmax, roi_ymax = [roi_box_np[:, k] for k in range(4)]
    gt_xct = ((gt_xmin + gt_xmax) / 2)[gt_pos_roi]
    gt_yct = ((gt_ymin + gt_ymax) / 2)[gt_pos_roi]
    gtw = (gt_xmax - gt_xmin)[gt_pos_roi]
    gth = (gt_ymax - gt_ymin)[gt_pos_roi]
    roi_xct = ((roi_xmin + roi_xmax) / 2)[idx_pos_roi]
    roi_yct = ((roi_ymin + roi_ymax) / 2)[idx_pos_roi]
    roiw = (roi_xmax - roi_xmin)[idx_pos_roi]
    roih = (roi_ymax - roi_ymin)[idx_pos_roi]
    tx = (gt_xct - roi_xct) / roiw
    ty = (gt_yct - roi_yct) / roih
    tw = np.log(gtw / roiw)
    th = np.log(gth / roih)
    pos_labels = labels_np[gt_pos_roi]

    n_pos = len(idx_pos_roi)
    assert n_pos <= P_PAD

    gt_cls = np.full((n_roi,), -1, dtype=np.int32)
    gt_cls[idx_pos_roi] = pos_labels.astype(np.int32) + 1
    gt_cls[idx_neg_roi] = 0

    # Padded loc-side operands: gt targets / unit weights scattered into the selected class
    # window of a (P_PAD, 4*C_fg) slab on host.  The class-specific gather of pred_loc itself
    # happens INSIDE the loss kernel (pred_loc takes no host or extra-XLA detour).
    idx_pad = np.zeros((P_PAD, 1), dtype=np.int32)
    gt_loc_w = np.zeros((P_PAD, 4 * c_fg), dtype=np.float32)
    loc_w = np.zeros((P_PAD, 4 * c_fg), dtype=np.float32)
    if n_pos > 0:
        idx_pad[:n_pos, 0] = idx_pos_roi
        cls_pos = labels_np[gt_pos_roi].astype(np.int32)
        cols = cls_pos[:, None] * 4 + np.arange(4)[None, :]
        rows = np.arange(n_pos)[:, None]
        gt_loc_w[rows, cols] = np.stack([tx, ty, tw, th], axis=1).astype(np.float32)
        loc_w[rows, cols] = 1.0

    return head_loss_pallas(
        pred_cls_t,
        jnp.asarray(gt_cls[None, :], dtype=jnp.int32),
        pred_loc2,
        jnp.asarray(idx_pad),
        jnp.asarray(gt_loc_w),
        jnp.asarray(loc_w),
    )


# ----------------------------------------------------------------------------
if __name__ == "__main__":
    random.seed(0)
    key = jax.random.PRNGKey(0)
    n_gt, n_roi, num_fg = 8, 256, 7
    n_cls = num_fg + 1  # background + fg classes

    k1, k2, k3, k4, k5, k6, k7, k8 = jax.random.split(key, 8)

    # GT boxes inside a 512x512 image
    ct = jax.random.uniform(k1, (n_gt, 2), minval=100.0, maxval=400.0)
    wh = jax.random.uniform(k2, (n_gt, 2), minval=40.0, maxval=120.0)
    gt = jnp.concatenate([ct - wh / 2, ct + wh / 2], axis=1).astype(jnp.float32)   # (n_gt, 4)
    gt_box = gt[None]                                                              # (1, n_gt, 4)
    labels = jax.random.randint(k3, (1, n_gt), 0, num_fg)                           # (1, n_gt)

    # ROIs: first 2*n_gt are jittered GT copies (positives), rest random small boxes
    jitter = jax.random.uniform(k4, (2 * n_gt, 4), minval=-3.0, maxval=3.0)
    pos_rois = jnp.tile(gt, (2, 1)) + jitter
    rnd_ct = jax.random.uniform(k5, (n_roi - 2 * n_gt, 2), minval=0.0, maxval=512.0)
    rnd_wh = jax.random.uniform(k6, (n_roi - 2 * n_gt, 2), minval=8.0, maxval=32.0)
    rnd_rois = jnp.concatenate([rnd_ct - rnd_wh / 2, rnd_ct + rnd_wh / 2], axis=1)
    roi_box = jnp.concatenate([pos_rois, rnd_rois], axis=0).astype(jnp.float32)    # (n_roi, 4)

    # Head predictions
    pred_cls = jax.random.normal(k7, (n_roi, n_cls), dtype=jnp.float32)
    pred_loc = 0.1 * jax.random.normal(k8, (n_roi, num_fg, 4), dtype=jnp.float32)

    loss = head_loss_forward(pred_cls, pred_loc, gt_box, roi_box, labels)
    jax.block_until_ready(loss)
    loss_val = float(np.asarray(loss)[0, 0])
    assert np.isfinite(loss_val)
    print("KERNEL_OK")
</pallas_src>

<mosaic_0001>
module attributes {stable_mosaic.version = 11 : i64} {
  func.func @kernel(%arg0: i32, %arg1: memref<8x1xf32, #tpu.memory_space<vmem>>, %arg2: memref<8x1xf32, #tpu.memory_space<vmem>>, %arg3: memref<8x1xf32, #tpu.memory_space<vmem>>, %arg4: memref<8x1xf32, #tpu.memory_space<vmem>>, %arg5: memref<8x1xf32, #tpu.memory_space<vmem>>, %arg6: memref<4x256xf32, #tpu.memory_space<vmem>>, %arg7: memref<2x256xi32, #tpu.memory_space<vmem>>) attributes {dimension_semantics = [#tpu.dimension_semantics<parallel>], iteration_bounds = array<i64: 1>, scalar_prefetch = 0 : i64, scratch_operands = 0 : i64, tpu.core_type = #tpu.core_type<tc>, window_params = [{pipeline_mode = #tpu.pipeline_mode<synchronous>, transform_indices = @transform_0, window_bounds = array<i64: 8, 1>}, {pipeline_mode = #tpu.pipeline_mode<synchronous>, transform_indices = @transform_1, window_bounds = array<i64: 8, 1>}, {pipeline_mode = #tpu.pipeline_mode<synchronous>, transform_indices = @transform_2, window_bounds = array<i64: 8, 1>}, {pipeline_mode = #tpu.pipeline_mode<synchronous>, transform_indices = @transform_3, window_bounds = array<i64: 8, 1>}, {pipeline_mode = #tpu.pipeline_mode<synchronous>, transform_indices = @transform_4, window_bounds = array<i64: 8, 1>}, {transform_indices = @transform_5, window_bounds = array<i64: 4, 256>}, {transform_indices = @transform_6, window_bounds = array<i64: 2, 256>}]} {
    %c0 = arith.constant 0 : index
    %c0_0 = arith.constant 0 : index
    %0 = vector.load %arg1[%c0, %c0_0] : memref<8x1xf32, #tpu.memory_space<vmem>>, vector<8x1xf32>
    %c0_1 = arith.constant 0 : index
    %c0_2 = arith.constant 0 : index
    %1 = vector.load %arg2[%c0_1, %c0_2] : memref<8x1xf32, #tpu.memory_space<vmem>>, vector<8x1xf32>
    %c0_3 = arith.constant 0 : index
    %c0_4 = arith.constant 0 : index
    %2 = vector.load %arg3[%c0_3, %c0_4] : memref<8x1xf32, #tpu.memory_space<vmem>>, vector<8x1xf32>
    %c0_5 = arith.constant 0 : index
    %c0_6 = arith.constant 0 : index
    %3 = vector.load %arg4[%c0_5, %c0_6] : memref<8x1xf32, #tpu.memory_space<vmem>>, vector<8x1xf32>
    %c0_7 = arith.constant 0 : index
    %c0_8 = arith.constant 0 : index
    %4 = vector.load %arg5[%c0_7, %c0_8] : memref<8x1xf32, #tpu.memory_space<vmem>>, vector<8x1xf32>
    %c0_9 = arith.constant 0 : index
    %c0_10 = arith.constant 0 : index
    %5 = vector.load %arg6[%c0_9, %c0_10] : memref<4x256xf32, #tpu.memory_space<vmem>>, vector<4x256xf32>
    %6 = vector.extract_strided_slice %5 {offsets = [0, 0], sizes = [1, 256], strides = [1, 1]} : vector<4x256xf32> to vector<1x256xf32>
    %7 = vector.extract_strided_slice %5 {offsets = [1, 0], sizes = [1, 256], strides = [1, 1]} : vector<4x256xf32> to vector<1x256xf32>
    %8 = vector.extract_strided_slice %5 {offsets = [2, 0], sizes = [1, 256], strides = [1, 1]} : vector<4x256xf32> to vector<1x256xf32>
    %9 = vector.extract_strided_slice %5 {offsets = [3, 0], sizes = [1, 256], strides = [1, 1]} : vector<4x256xf32> to vector<1x256xf32>
    %10 = vector.broadcast %0 : vector<8x1xf32> to vector<8x256xf32>
    %11 = vector.broadcast %6 : vector<1x256xf32> to vector<8x256xf32>
    %12 = arith.maximumf %10, %11 : vector<8x256xf32>
    %13 = vector.broadcast %1 : vector<8x1xf32> to vector<8x256xf32>
    %14 = vector.broadcast %7 : vector<1x256xf32> to vector<8x256xf32>
    %15 = arith.maximumf %13, %14 : vector<8x256xf32>
    %16 = vector.broadcast %2 : vector<8x1xf32> to vector<8x256xf32>
    %17 = vector.broadcast %8 : vector<1x256xf32> to vector<8x256xf32>
    %18 = arith.minimumf %16, %17 : vector<8x256xf32>
    %19 = vector.broadcast %3 : vector<8x1xf32> to vector<8x256xf32>
    %20 = vector.broadcast %9 : vector<1x256xf32> to vector<8x256xf32>
    %21 = arith.minimumf %19, %20 : vector<8x256xf32>
    %22 = arith.subf %18, %12 : vector<8x256xf32>
    %cst = arith.constant 0.000000e+00 : f32
    %23 = vector.broadcast %cst : f32 to vector<8x256xf32>
    %24 = arith.maximumf %22, %23 : vector<8x256xf32>
    %25 = arith.subf %21, %15 : vector<8x256xf32>
    %cst_11 = arith.constant 0.000000e+00 : f32
    %26 = vector.broadcast %cst_11 : f32 to vector<8x256xf32>
    %27 = arith.maximumf %25, %26 : vector<8x256xf32>
    %28 = arith.mulf %24, %27 : vector<8x256xf32>
    %29 = arith.subf %8, %6 : vector<1x256xf32>
    %30 = arith.subf %9, %7 : vector<1x256xf32>
    %31 = arith.mulf %29, %30 : vector<1x256xf32>
    %32 = vector.broadcast %31 : vector<1x256xf32> to vector<8x256xf32>
    %33 = vector.broadcast %4 : vector<8x1xf32> to vector<8x256xf32>
    %34 = arith.addf %32, %33 : vector<8x256xf32>
    %35 = arith.subf %34, %28 : vector<8x256xf32>
    %cst_12 = arith.constant 9.99999993E-9 : f32
    %36 = vector.broadcast %cst_12 : f32 to vector<8x256xf32>
    %37 = arith.addf %35, %36 : vector<8x256xf32>
    %38 = arith.divf %28, %37 : vector<8x256xf32>
    %39 = tpu.bitcast %38 : vector<8x256xf32> -> vector<8x256xi32>
    %40 = tpu.iota {dimensions = array<i32: 0>} : vector<8x256xi32>
    %c7_i32 = arith.constant 7 : i32
    %41 = vector.broadcast %c7_i32 : i32 to vector<8x256xi32>
    %42 = arith.subi %41, %40 : vector<8x256xi32>
    %c-8_i32 = arith.constant -8 : i32
    %43 = vector.broadcast %c-8_i32 : i32 to vector<8x256xi32>
    %44 = arith.andi %39, %43 : vector<8x256xi32>
    %45 = arith.ori %44, %42 : vector<8x256xi32>
    %cst_13 = arith.constant dense<-2147483648> : vector<256xi32>
    %46 = vector.multi_reduction <maxsi>, %45, %cst_13 [0] : vector<8x256xi32> to vector<256xi32>
    %47 = vector.shape_cast %46 : vector<256xi32> to vector<1x256xi32>
    %c7_i32_14 = arith.constant 7 : i32
    %48 = vector.broadcast %c7_i32_14 : i32 to vector<1x256xi32>
    %49 = arith.andi %47, %48 : vector<1x256xi32>
    %c7_i32_15 = arith.constant 7 : i32
    %50 = vector.broadcast %c7_i32_15 : i32 to vector<1x256xi32>
    %51 = arith.subi %50, %49 : vector<1x256xi32>
    %c-8_i32_16 = arith.constant -8 : i32
    %52 = vector.broadcast %c-8_i32_16 : i32 to vector<1x256xi32>
    %53 = arith.andi %47, %52 : vector<1x256xi32>
    %54 = tpu.bitcast %53 : vector<1x256xi32> -> vector<1x256xf32>
    %cst_17 = arith.constant 5.000000e-01 : f32
    %55 = vector.broadcast %cst_17 : f32 to vector<1x256xf32>
    %56 = arith.cmpf ogt, %54, %55 : vector<1x256xf32>
    %cst_18 = arith.constant 1.000000e-01 : f32
    %57 = vector.broadcast %cst_18 : f32 to vector<1x256xf32>
    %58 = arith.cmpf ole, %54, %57 : vector<1x256xf32>
    %c-1_i32 = arith.constant -1 : i32
    %c0_i32 = arith.constant 0 : i32
    %59 = vector.broadcast %c-1_i32 : i32 to vector<1x256xi32>
    %60 = vector.broadcast %c0_i32 : i32 to vector<1x256xi32>
    %61 = arith.select %58, %59, %60 : vector<1x256xi1>, vector<1x256xi32>
    %c1_i32 = arith.constant 1 : i32
    %62 = vector.broadcast %c1_i32 : i32 to vector<1x256xi32>
    %63 = arith.select %56, %62, %61 : vector<1x256xi1>, vector<1x256xi32>
    %c0_19 = arith.constant 0 : index
    %c0_20 = arith.constant 0 : index
    %64 = vector.load %arg7[%c0_19, %c0_20] : memref<2x256xi32, #tpu.memory_space<vmem>>, vector<1x256xi32>
    tpu.vector_store %arg7[%c0_19, %c0_20], %63 {strides = array<i32>} : memref<2x256xi32, #tpu.memory_space<vmem>>, vector<1x256xi32>,
    %c1 = arith.constant 1 : index
    %c0_21 = arith.constant 0 : index
    %65 = vector.load %arg7[%c1, %c0_21] : memref<2x256xi32, #tpu.memory_space<vmem>>, vector<1x256xi32>
    tpu.vector_store %arg7[%c1, %c0_21], %51 {strides = array<i32>} : memref<2x256xi32, #tpu.memory_space<vmem>>, vector<1x256xi32>,
    return
  }
  func.func @transform_0(%arg0: i32) -> (i32, i32) {
    %c0_i32 = arith.constant 0 : i32
    %c0_i32_0 = arith.constant 0 : i32
    %c0_i32_1 = arith.constant 0 : i32
    return %c0_i32, %c0_i32_0 : i32, i32
  }
  func.func @transform_1(%arg0: i32) -> (i32, i32) {
    %c0_i32 = arith.constant 0 : i32
    %c0_i32_0 = arith.constant 0 : i32
    %c0_i32_1 = arith.constant 0 : i32
    return %c0_i32, %c0_i32_0 : i32, i32
  }
  func.func @transform_2(%arg0: i32) -> (i32, i32) {
    %c0_i32 = arith.constant 0 : i32
    %c0_i32_0 = arith.constant 0 : i32
    %c0_i32_1 = arith.constant 0 : i32
    return %c0_i32, %c0_i32_0 : i32, i32
  }
  func.func @transform_3(%arg0: i32) -> (i32, i32) {
    %c0_i32 = arith.constant 0 : i32
    %c0_i32_0 = arith.constant 0 : i32
    %c0_i32_1 = arith.constant 0 : i32
    return %c0_i32, %c0_i32_0 : i32, i32
  }
  func.func @transform_4(%arg0: i32) -> (i32, i32) {
    %c0_i32 = arith.constant 0 : i32
    %c0_i32_0 = arith.constant 0 : i32
    %c0_i32_1 = arith.constant 0 : i32
    return %c0_i32, %c0_i32_0 : i32, i32
  }
  func.func @transform_5(%arg0: i32) -> (i32, i32) {
    %c0_i32 = arith.constant 0 : i32
    %c0_i32_0 = arith.constant 0 : i32
    return %c0_i32, %arg0 : i32, i32
  }
  func.func @transform_6(%arg0: i32) -> (i32, i32) {
    %c0_i32 = arith.constant 0 : i32
    %c0_i32_0 = arith.constant 0 : i32
    return %c0_i32, %arg0 : i32, i32
  }
}

</mosaic_0001>

<bundles_post_ra>
// kernel: tpu_custom_call.1
= control target key start
LH: loop header
LB: loop body
LE: loop exit
PB: predicated region body
PF: predicated region fallthrough
CT: control target
= control target key end

     0   :  { %v256_v2 = vmov 0   ;;  %s327_s0 = inlined_call_operand.vmem [shape: f32[8,1], index: 0, kind: input, shape index: {}]   ;;  %s328_s1 = inlined_call_operand.vmem [shape: f32[8,1], index: 1, kind: input, shape index: {}]   ;;  %s329_s2 = inlined_call_operand.vmem [shape: f32[8,1], index: 2, kind: input, shape index: {}]   ;;  %s330_s3 = inlined_call_operand.vmem [shape: f32[8,1], index: 3, kind: input, shape index: {}]   ;;  %s331_s4 = inlined_call_operand.vmem [shape: f32[8,1], index: 4, kind: input, shape index: {}]   ;;  %s332_s5 = inlined_call_operand.vmem [shape: f32[4,256], index: 5, kind: input, shape index: {}]   ;;  %s333_s6 = inlined_call_operand.hbm [shape: s32[2,256], index: 6, kind: output, shape index: {}]  }
   0x1   :  { %v26_v0 = vld [vmem:[%s329_s2] sm:$0xff]  ;;  %224 = vset.pattern.permute.xlu1 %v256_v2  ;;  %223 = vset.pattern.permute.xlu0 %v256_v2 }
   0x2   :  { %v24_v1 = vld [vmem:[%s327_s0] sm:$0xff]  ;;  %59 = vperm.xlu1 %224, %v26_v0  }
   0x3   :  { %v28_v3 = vld [vmem:[%s331_s4] sm:$0xff]  ;;  %32 = vperm.xlu0 %223, %v24_v1  }
   0x4   :  { %11 = vsyncpa [#allocation3], 0  ;;  %225 = vset.pattern.permute.xlu2 %v256_v2  ;;  %v27_v4 = vld [vmem:[%s330_s3] sm:$0xff]  ;;  %v151_v1 = vlaneseq  ;;  %s211_s7 = sshll.u32 %s333_s6, 4  ;;  %s212_s7 = int_to_ptr.hbm [resolvable:$true] %s211_s7 }
   0x5   :  { %110 = vperm.xlu2 %225, %v28_v3   ;;  %v25_v5 = vld [vmem:[%s328_s1] sm:$0xff]  ;;  %s257_s1 = smov [#allocation2]  }
   0x6   :  { %v29_v6 = vld [vmem:[%s332_s5] sm:$0xff]  ;;  %s209_s3 = sshll.u32 %s257_s1, 4  ;;  %s210_s3 = int_to_ptr.vmem [resolvable:$true] %s209_s3 }
   0x7   :  { %v93_v7 = vrot.slane %v29_v6, 6  ;;  %v62_v10 = vperm.slane %v29_v6, 2  ;;  %v63_v11 = vperm.slane %v29_v6, 6  ;;  %v36_v12 = vperm.slane %v29_v6, 0 }
   0x8   :  { %v37_v13 = vperm.slane %v29_v6, 4  ;;  %v75_v21 = vperm.slane %v29_v6, 3  ;;  %v76_v22 = vperm.slane %v29_v6, 7  ;;  %v49_v23 = vperm.slane %v29_v6, 1 }
   0x9   :  { %v95_v8 = vsub.f32 %v29_v6, %v93_v7  ;;  %v66_v15 = vperm.slane %v62_v10, 2  ;;  %v67_v16 = vperm.slane %v63_v11, 2  ;;  %v40_v18 = vperm.slane %v36_v12, 0 }
   0xa   :  { %72 = vperm.xlu1 %224, %v27_v4   ;;  %v41_v19 = vperm.slane %v37_v13, 0  ;;  %v50_v24 = vperm.slane %v29_v6, 5  ;;  %v79_v31 = vperm.slane %v75_v21, 3  ;;  %v80_v32 = vperm.slane %v76_v22, 3 }
   0xb   :  { %46 = vperm.xlu0 %223, %v25_v5   ;;  %v220_v9 = vrot.slane %v95_v8, 9  ;;  %v53_v33 = vperm.slane %v49_v23, 1  ;;  %v152_v11 = vshrl.u32 %v151_v1, 7 }
   0xc   :  { %v54_v34 = vperm.slane %v50_v24, 1 }
   0xd   :  { %v100_v14 = vmul.f32 %v220_v9, %v95_v8 }
   0xf   :  { %v102_v25 = vperm.slane %v100_v14, 2  ;;  %v103_v26 = vperm.slane %v100_v14, 6 }
  0x11   :  { %v106_v39 = vperm.slane %v102_v25, 2  ;;  %v107_v40 = vperm.slane %v103_v26, 2 }
  0x5f   :  { %v111_v45 = vpop.permute.xlu2 %110 }
  0x60   :  { %v113_v48 = vadd.f32 %v111_v45, %v106_v39  ;;  %v114_v49 = vadd.f32 %v111_v45, %v107_v40 }
  0x74   :  { %v60_v17 = vpop.permute.xlu1 %59 }
  0x75   :  { %v33_v20 = vpop.permute.xlu0 %32  ;;  %v68_v27 = vmin.f32 %v60_v17, %v66_v15  ;;  %v69_v28 = vmin.f32 %v60_v17, %v67_v16 }
  0x76   :  { %v42_v29 = vmax.f32 %v33_v20, %v40_v18  ;;  %v43_v30 = vmax.f32 %v33_v20, %v41_v19  ;;  %v153_v20 = vsub.s32 7, %v152_v11 }
  0x78   :  { %v83_v35 = vsub.f32 %v68_v27, %v42_v29  ;;  %v84_v36 = vsub.f32 %v69_v28, %v43_v30 }
  0x7a   :  { %v85_v50 = vmax.f32 %v83_v35, 0.0  ;;  %v86_v51 = vmax.f32 %v84_v36, 0.0 }
  0x7c   :  { %v73_v37 = vpop.permute.xlu1 %72 }
  0x7d   :  { %v47_v38 = vpop.permute.xlu0 %46  ;;  %v81_v41 = vmin.f32 %v73_v37, %v79_v31  ;;  %v82_v42 = vmin.f32 %v73_v37, %v80_v32 }
  0x7e   :  { %v55_v43 = vmax.f32 %v47_v38, %v53_v33  ;;  %v56_v44 = vmax.f32 %v47_v38, %v54_v34 }
  0x80   :  { %v87_v46 = vsub.f32 %v81_v41, %v55_v43  ;;  %v88_v47 = vsub.f32 %v82_v42, %v56_v44 }
  0x82   :  { %v89_v52 = vmax.f32 %v87_v46, 0.0  ;;  %v90_v53 = vmax.f32 %v88_v47, 0.0 }
  0x84   :  { %v91_v54 = vmul.f32 %v89_v52, %v85_v50  ;;  %v92_v55 = vmul.f32 %v90_v53, %v86_v51 }
  0x86   :  { %v115_v56 = vsub.f32 %v113_v48, %v91_v54  ;;  %v116_v57 = vsub.f32 %v114_v49, %v92_v55 }
  0x88   :  { %v117_v58 = vadd.f32 1e-08, %v115_v56  ;;  %v118_v59 = vadd.f32 1e-08, %v116_v57 }
  0x8a   :  { %226 = vrcp.f32 %v117_v58  ;;  %v130_v3 = vand.u32 2147483648, %v117_v58  ;;  %v128_v6 = vand.u32 2147483647, %v117_v58  ;;  %v145_v7 = vand.u32 2147483648, %v118_v59 }
  0x8b   :  { %228 = vrcp.f32 %v118_v59  ;;  %v143_v9 = vand.u32 2147483647, %v118_v59  ;;  %vm124_vm2 = vweird.f32 %v117_v58  ;;  %vm139_vm4 = vweird.f32 %v118_v59 }
  0x8c   :  { %v131_v12 = vor.u32 1.1754944e-38, %v130_v3  ;;  %vm129_vm5 = vcmp.eq.f32.partialorder %v128_v6, 8.507059e+37  ;;  %v146_v15 = vor.u32 1.1754944e-38, %v145_v7 }
  0x8d   :  { %vm144_vm7 = vcmp.eq.f32.partialorder %v143_v9, 8.507059e+37 }
  0x90   :  { %v227_v60 = vpop.eup %226 }
  0x91   :  { %v229_v61 = vpop.eup %228  ;;  %v120_v62 = vmul.f32 %v227_v60, %v117_v58  ;;  %vm125_vm0 = vweird.f32 %v227_v60 }
  0x92   :  { %v135_v63 = vmul.f32 %v229_v61, %v118_v59  ;;  %vm140_vm1 = vweird.f32 %v229_v61  ;;  %vm126_vm3 = vmor %vm124_vm2, %vm125_vm0  ;;  %vm193_vm2 = vcmask 1040384  }
  0x93   :  { %v121_v0 = vsub.f32 1.0, %v120_v62  ;;  %vm141_vm6 = vmor %vm139_vm4, %vm140_vm1 }
  0x94   :  { %v136_v4 = vsub.f32 1.0, %v135_v63 }
  0x95   :  { %v122_v5 = vmul.f32 %v227_v60, %v121_v0 }
  0x96   :  { %v137_v8 = vmul.f32 %v229_v61, %v136_v4 }
  0x97   :  { %v123_v10 = vadd.f32 %v227_v60, %v122_v5 }
  0x98   :  { %v138_v13 = vadd.f32 %v229_v61, %v137_v8 }
  0x99   :  { %v127_v14 = vsel %vm126_vm3, %v227_v60, %v123_v10  ;;  %vm197_vm3 = vcmp.lt.s32.totalorder %v151_v1, 256 }
  0x9a   :  { %v132_v16 = vsel %vm129_vm5, %v131_v12, %v127_v14  ;;  %v142_v17 = vsel %vm141_vm6, %v229_v61, %v138_v13 }
  0x9b   :  { %v133_v18 = vmul.f32 %v132_v16, %v91_v54  ;;  %v147_v19 = vsel %vm144_vm7, %v146_v15, %v142_v17 }
  0x9c   :  { %v148_v21 = vmul.f32 %v147_v19, %v92_v55 }
  0x9d   :  { %v154_v22 = vand.u32 4294967288, %v133_v18 }
  0x9e   :  { %v155_v23 = vand.u32 4294967288, %v148_v21 }
  0x9f   :  { %v156_v24 = vor.u32 %v154_v22, %v153_v20 }
  0xa0   :  { %v157_v25 = vor.u32 %v155_v23, %v153_v20 }
  0xa1   :  { %v158_v26 = vrot.slane %v156_v24, 4 }
  0xa2   :  { %v167_v27 = vrot.slane %v157_v25, 4 }
  0xa3   :  { %vm159_vm8 = vcmp.gt.s32.totalorder %v156_v24, %v158_v26 }
  0xa4   :  { %v160_v28 = vsel %vm159_vm8, %v156_v24, %v158_v26  ;;  %vm168_vm9 = vcmp.gt.s32.totalorder %v157_v25, %v167_v27 }
  0xa5   :  { %v161_v29 = vrot.slane %v160_v28, 2  ;;  %v169_v30 = vsel %vm168_vm9, %v157_v25, %v167_v27 }
  0xa6   :  { %v170_v31 = vrot.slane %v169_v30, 2 }
  0xa7   :  { %vm162_vm10 = vcmp.gt.s32.totalorder %v160_v28, %v161_v29 }
  0xa8   :  { %v163_v32 = vsel %vm162_vm10, %v160_v28, %v161_v29  ;;  %vm171_vm11 = vcmp.gt.s32.totalorder %v169_v30, %v170_v31 }
  0xa9   :  { %v164_v33 = vrot.slane %v163_v32, 1  ;;  %v172_v34 = vsel %vm171_vm11, %v169_v30, %v170_v31 }
  0xaa   :  { %v173_v35 = vrot.slane %v172_v34, 1 }
  0xab   :  { %vm165_vm12 = vcmp.gt.s32.totalorder %v163_v32, %v164_v33 }
  0xac   :  { %v166_v36 = vsel %vm165_vm12, %v163_v32, %v164_v33  ;;  %vm174_vm13 = vcmp.gt.s32.totalorder %v172_v34, %v173_v35 }
  0xad   :  { %v175_v37 = vsel %vm174_vm13, %v172_v34, %v173_v35  ;;  %v180_v38 = vand.u32 4294967288, %v166_v36  ;;  %v176_v39 = vand.u32 7, %v166_v36 }
  0xae   :  { %v177_v40 = vand.u32 7, %v175_v37  ;;  %v181_v41 = vand.u32 4294967288, %v175_v37 }
  0xaf   :  { %vm186_vm14 = vcmp.le.f32.partialorder %v180_v38, 0.1  ;;  %vm315_vm1 = vcmp.gt.f32.partialorder %v180_v38, 0.5  ;;  %v178_v46 = vsub.s32 7, %v176_v39 }
  0xb0   :  { %v179_v42 = vsub.s32 7, %v177_v40  ;;  %vm185_vm15 = vcmp.gt.f32.partialorder %v181_v41, 0.5  ;;  %vm187_vm0 = vcmp.le.f32.partialorder %v181_v41, 0.1  ;;  %v188_v44 = vsel %vm186_vm14, 4294967295, %v256_v2 }
  0xb1   :  { %v189_v45 = vsel %vm187_vm0, 4294967295, %v256_v2  ;;  %v190_v50 = vsel %vm315_vm1, 1, %v188_v44 }
  0xb2   :  { %v191_v47 = vsel %vm185_vm15, 1, %v189_v45  ;;  %v200_v48 = vrot.slane %v179_v42, 7 }
  0xb3   :  { %v192_v49 = vrot.slane %v191_v47, 7 }
  0xb4   :  { %v201_v51 = vsel %vm193_vm2, %v178_v46, %v200_v48 }
  0xb5   :  { %v194_v2 = vsel %vm193_vm2, %v190_v50, %v192_v49  ;;  %203 = vst.msk [vmem:[#allocation2 + $0x1] ss:$2 sm:$0x3] %vm197_vm3, %v201_v51 }
  0xb6   :  { %199 = vst.msk [vmem:[#allocation2] ss:$2 sm:$0x3] %vm197_vm3, %v194_v2 }
  0xb7   :  { %214 = dma.vmem_to_hbm [thread:$0]  %s210_s3, 64, %s212_s7, [#allocation3]  }
  0xb8   :  { %254 = dma.done.wait [#allocation3], 64  }
  0xb9   :  { %255 = vsyncadd [#allocation3], 4294967232 }
  0xba   :  { %219 = vsyncpa [#allocation3], 1 }

</bundles_post_ra>
